<compile_context>
chip_gen: v5e
topology: v5e:2x2
jax: 0.10.0
libtpu: 0.0.40
codegen_flags: <defaults>
</compile_context>

<pallas_src>
import functools

import jax
import jax.numpy as jnp
from jax.experimental import pallas as pl
from jax.experimental.pallas import tpu as pltpu


_WT_ELEMS = 32 * 1024          # ~32 f32 vregs: cap for in-kernel scores / one-hot chunks
_TILE_CAP = 512                # grid-level token-tile cap
_VMEM_TILE_BUDGET = 24 << 20   # double-buffered input-tile budget, portable v5e/v6e/v7x


# ------------------------------------------------------------------------------ helpers
def _pick_tile(n, cap, align=8):
    """Largest multiple-of-`align` tile <= cap that divides n, else n (full dim)."""
    if n <= cap:
        return n
    for t in range(cap - cap % align, align - 1, -align):
        if n % t == 0:
            return t
    return n


def _mosaic_params(dimension_semantics, est_vmem_bytes):
    """CompilerParams; raise the scoped-VMEM limit explicitly only when the estimated
    working set exceeds v5e's 16 MiB default (capped below v7x's 64 MiB physical VMEM)."""
    kwargs = dict(dimension_semantics=dimension_semantics)
    if est_vmem_bytes > (14 << 20):
        kwargs["vmem_limit_bytes"] = int(
            min(max(est_vmem_bytes * 3 // 2, 32 << 20), 56 << 20))
    return pltpu.CompilerParams(**kwargs)


# ------------------------------------------------------------------------------ kernels
def _score_kernel(a_ref, b_ref, max_ref, idx_ref, m_sc, i_sc):
    """Cosine-similarity tile + online (max, first-hit argmax) reduction over Tb.

    grid = (B, Ta/tq, Tb/tk); Tb is the innermost ("arbitrary") reduction axis.
      a_ref: (1, tq, C) pre-normalized   b_ref: (1, tk, C) pre-normalized
      max_ref / idx_ref: (1, tq, 1) output tiles (revisited across the Tb axis)
      m_sc / i_sc: (tq, 1) VMEM scratch carrying the running max / argmax.
    The tk tile is reduced in ck-sized chunks so each (tq, ck) scores block stays ~<=32
    vregs (it is read twice: max, then first-hit compare) — no register-file spill.
    """
    ki = pl.program_id(2)
    nk = pl.num_programs(2)
    tq = a_ref.shape[1]
    tk = b_ref.shape[1]
    ck = _pick_tile(tk, max(8, min(128, _WT_ELEMS // max(tq, 8))), align=8)
    nck = tk // ck

    @pl.when(ki == 0)
    def _init():
        m_sc[...] = jnp.full_like(m_sc, -jnp.inf)
        i_sc[...] = jnp.zeros_like(i_sc)

    a = a_ref[0]                                               # (tq, C) f32, normalized

    def _chunk(c, carry):
        off = pl.multiple_of(c * ck, ck)
        bch = b_ref[0, pl.ds(off, ck), :]                      # (ck, C)
        # f32-in / f32-acc on purpose: bf16-rounded scores can flip the downstream
        # argsort / argmax token selection (semantics, not just numerics).
        scores = jax.lax.dot_general(
            a, bch, (((1,), (1,)), ((), ())),
            preferred_element_type=jnp.float32)                # (tq, ck)
        loc_max = jnp.max(scores, axis=-1, keepdims=True)      # (tq, 1)
        col = jax.lax.broadcasted_iota(jnp.int32, scores.shape, 1)
        # First-hit argmax inside the chunk (deterministic tie-break, matches torch.max).
        loc_idx = jnp.min(jnp.where(scores == loc_max, col, ck),
                          axis=-1, keepdims=True) + (ki * tk + off)
        # Strict '>' keeps the earliest chunk/tile on ties (first-hit semantics).
        better = loc_max > m_sc[...]
        m_sc[...] = jnp.where(better, loc_max, m_sc[...])
        i_sc[...] = jnp.where(better, loc_idx, i_sc[...])
        return carry

    jax.lax.fori_loop(0, nck, _chunk, 0, unroll=nck <= 8)

    @pl.when(ki == nk - 1)
    def _finalize():
        # TODO(synk): emit lane-dense (B, 1, Ta) outputs (needs a verified sublane->lane
        # relayout or a transposed-scores variant); outputs are O(N) scalars so the win is
        # small, and the column store is the proven-to-lower path.
        max_ref[0] = m_sc[...]
        idx_ref[0] = i_sc[...]


def _merge_kernel(map_ref, src_ref, dst_ref, out_ref, acc_ref, cnt_ref):
    """dst' = (dst + sum of merged src routed by dst_of_src) / (1 + counts).

    grid = (B, Ta/ts) with the src axis as the innermost ("arbitrary") reduction axis.
      map_ref: (1, 1, ts) int32 dst row for each src-half token, -1 = not merged
      src_ref: (1, ts, Cf) raw src-half features (never pre-gathered in HBM)
      dst_ref / out_ref: (1, Tb, Cf) — the dst half stays VMEM-resident per batch
      acc_ref: (Tb, Cf) f32 routed sums      cnt_ref: (Tb, 1) f32 routed counts.
    The one-hot routing matrix is built in (cb, ts) chunks in-kernel (<= ~32 vregs) and
    never touches HBM; the features go through the MXU in f32 (no bf16 rounding).
    """
    si = pl.program_id(1)
    ns = pl.num_programs(1)
    ts = src_ref.shape[1]
    tb = dst_ref.shape[1]
    cb = _pick_tile(tb, max(8, min(256, _WT_ELEMS // max(ts, 8))), align=8)
    nchunks = tb // cb

    @pl.when(si == 0)
    def _init():
        acc_ref[...] = jnp.zeros_like(acc_ref)
        cnt_ref[...] = jnp.zeros_like(cnt_ref)

    tgt = map_ref[0]                                           # (1, ts) int32 routing map

    def _chunk(c, carry):
        off = pl.multiple_of(c * cb, cb)
        rows = jax.lax.broadcasted_iota(jnp.int32, (cb, ts), 0) + off   # absolute dst rows
        wt = (rows == tgt).astype(jnp.float32)                 # (cb, ts) one-hot rows
        # Routing matmul: f32 in / f32 acc — the features (incl. xyz) are not rounded.
        acc_ref[pl.ds(off, cb), :] += jnp.dot(
            wt, src_ref[0], preferred_element_type=jnp.float32)
        # Counts ride the already-built one-hot chunk on the otherwise idle XLU slot.
        cnt_ref[pl.ds(off, cb), :] += jnp.sum(wt, axis=-1, keepdims=True)
        return carry

    jax.lax.fori_loop(0, nchunks, _chunk, 0, unroll=nchunks <= 8)

    @pl.when(si == ns - 1)
    def _finalize():
        # Exact divide (no approx reciprocal): scatter_reduce(mean) semantics.
        out_ref[0] = ((dst_ref[0].astype(jnp.float32) + acc_ref[...])
                      / (1.0 + cnt_ref[...])).astype(out_ref.dtype)


# ----------------------------------------------------------------------- pallas wrappers
def _tome_scores(a, b, *, tile_cap=_TILE_CAP, vmem_budget=_VMEM_TILE_BUDGET):
    """Per-'a'-token max cosine similarity against 'b' + its first-hit argmax.

    Inputs are expected to be L2-normalized f32 (done once in plain JAX by the caller)."""
    B, Ta, C = a.shape
    Tb = b.shape[1]

    # Zero-pad the contraction dim to a sublane multiple: zeros change no dot product and
    # keep tiny metrics (xyz, C=3) MXU-legal.
    if C % 8:
        pad = 8 - C % 8
        a = jnp.pad(a, ((0, 0), (0, 0), (0, pad)))
        b = jnp.pad(b, ((0, 0), (0, 0), (0, pad)))
        C += pad

    # Tile cap derived from a portable VMEM budget (double-buffered a + b tiles).
    lane_c = -(-C // 128) * 128
    cap = max(128, min(tile_cap, (vmem_budget // (16 * lane_c)) // 8 * 8))
    tq = _pick_tile(Ta, cap)
    tk = _pick_tile(Tb, cap)

    # v7x megacore: make sure the parallel axes have >= 2 iterations when possible.
    if B * (Ta // tq) == 1 and tq >= 16:
        half = _pick_tile(Ta, max(8, (tq // 2) // 8 * 8))
        if half < tq:
            tq = half

    grid = (B, Ta // tq, Tb // tk)
    est = 4 * (4 * lane_c * (tq + tk) + 6 * 128 * tq)

    node_max, node_idx = pl.pallas_call(
        _score_kernel,
        out_shape=(
            jax.ShapeDtypeStruct((B, Ta, 1), jnp.float32),
            jax.ShapeDtypeStruct((B, Ta, 1), jnp.int32),
        ),
        grid_spec=pltpu.PrefetchScalarGridSpec(
            num_scalar_prefetch=0,
            grid=grid,
            in_specs=[
                pl.BlockSpec((1, tq, C), lambda bi, qi, ki: (bi, qi, 0)),
                pl.BlockSpec((1, tk, C), lambda bi, qi, ki: (bi, ki, 0)),
            ],
            out_specs=(
                pl.BlockSpec((1, tq, 1), lambda bi, qi, ki: (bi, qi, 0)),
                pl.BlockSpec((1, tq, 1), lambda bi, qi, ki: (bi, qi, 0)),
            ),
            scratch_shapes=[
                pltpu.VMEM((tq, 1), jnp.float32),
                pltpu.VMEM((tq, 1), jnp.int32),
            ],
        ),
        compiler_params=_mosaic_params(("parallel", "parallel", "arbitrary"), est),
    )(a, b)
    return node_max[:, :, 0], node_idx[:, :, 0]


def _merge_reduce(dst, src, dst_of_src, *, tile_cap=_TILE_CAP):
    """scatter_reduce(mean): route every merged src-half token into its dst row and average.

    dst: (B, Tb, Cf)   src: (B, Ta, Cf) raw src half   dst_of_src: (B, Ta) int32, -1 = keep.
    """
    B, Tb, Cf = dst.shape
    Ta = src.shape[1]

    # The routing-map block is lane-dense (last dim = ts), so ts must be a multiple of 128
    # or the full Ta; pad the src half with "-1 -> route nowhere" rows when needed.
    if Ta > tile_cap:
        if Ta % 128:
            pad = 128 - Ta % 128
            src = jnp.pad(src, ((0, 0), (0, pad), (0, 0)))
            dst_of_src = jnp.pad(dst_of_src, ((0, 0), (0, pad)), constant_values=-1)
            Ta += pad
        ts = _pick_tile(Ta, tile_cap, align=128)
    else:
        ts = Ta
    map3 = dst_of_src[:, None, :].astype(jnp.int32)            # (B, 1, Ta)
    grid = (B, Ta // ts)

    lane_cf = -(-Cf // 128) * 128
    est = 4 * (6 * Tb * lane_cf + Tb * 128 + 4 * ts * lane_cf + 8 * Ta)
    # TODO(synk): also tile the dst axis (and split it across cores when B == 1) once
    # Tb*Cf blocks stop fitting VMEM (~>32k dst tokens); for realistic point-cloud sizes
    # the dst-resident form reads/writes every HBM byte exactly once.
    return pl.pallas_call(
        _merge_kernel,
        out_shape=jax.ShapeDtypeStruct((B, Tb, Cf), dst.dtype),
        grid_spec=pltpu.PrefetchScalarGridSpec(
            num_scalar_prefetch=0,
            grid=grid,
            in_specs=[
                pl.BlockSpec((1, 1, ts), lambda bi, si: (bi, 0, si)),
                pl.BlockSpec((1, ts, Cf), lambda bi, si: (bi, si, 0)),
                pl.BlockSpec((1, Tb, Cf), lambda bi, si: (bi, 0, 0)),
            ],
            out_specs=pl.BlockSpec((1, Tb, Cf), lambda bi, si: (bi, 0, 0)),
            scratch_shapes=[
                pltpu.VMEM((Tb, Cf), jnp.float32),
                pltpu.VMEM((Tb, 1), jnp.float32),
            ],
        ),
        compiler_params=_mosaic_params(("parallel", "arbitrary"), est),
    )(map3, src, dst)


# --------------------------------------------------------------------- bipartite matching
def bipartite_soft_matching(metric, r):
    """ToMe bipartite soft matching. Returns (merge_fn, unmerge_fn) closures."""
    B, N, _ = metric.shape
    # ToMe semantics: at most half the tokens (the even-indexed "src" half) can merge.
    r = int(max(0, min(r, N // 2)))
    if r <= 0:
        return (lambda x: x), (lambda x: x)

    # L2-normalize ONCE in plain JAX (epsilon guarded) instead of renormalizing the
    # resident a-block every reduction step inside the kernel.
    m = metric.astype(jnp.float32)
    m = m * jax.lax.rsqrt(jnp.maximum(jnp.sum(m * m, axis=-1, keepdims=True), 1e-12))
    a, b = m[:, 0::2, :], m[:, 1::2, :]
    Ta = a.shape[1]

    node_max, node_idx = _tome_scores(a, b)                   # Pallas kernel

    edge_idx = jnp.argsort(-node_max, axis=-1)                # descending, stable
    unm_idx = edge_idx[:, r:]                                 # (B, Ta - r) kept src tokens
    src_idx = edge_idx[:, :r]                                 # (B, r)      merged src tokens
    dst_idx = jnp.take_along_axis(node_idx, src_idx, axis=1)  # (B, r)      their dst rows

    # Dense routing map: dst row for every src-half token, -1 = not merged.  The merge
    # kernel reads the raw src half directly, so the (B, r, Cf) src_sel gather never
    # materializes in HBM.
    bb = jnp.arange(B)[:, None]
    dst_of_src = jnp.full((B, Ta), -1, jnp.int32).at[bb, src_idx].set(
        dst_idx.astype(jnp.int32))

    def merge(x):
        src_half = x[:, 0::2, :]
        dst_half = x[:, 1::2, :]
        unm = jnp.take_along_axis(src_half, unm_idx[..., None], axis=1)
        dst_new = _merge_reduce(dst_half, src_half, dst_of_src)   # Pallas kernel
        return jnp.concatenate([unm, dst_new], axis=1)

    def unmerge(x):
        unm_len = unm_idx.shape[1]
        unm = x[:, :unm_len, :]
        dst = x[:, unm_len:, :]
        src = jnp.take_along_axis(dst, dst_idx[..., None], axis=1)
        Bx, _, Cx = x.shape
        out = jnp.zeros((Bx, N, Cx), x.dtype)
        out = out.at[:, 1::2, :].set(dst)
        out = out.at[bb, 2 * unm_idx, :].set(unm)
        out = out.at[bb, 2 * src_idx, :].set(src)
        return out

    return merge, unmerge


# ----------------------------------------------------------------------------- Merge fwd
def merge_forward(points, xyz, npoint, compress=False, use_xyz=False):
    """Equivalent of Merge(npoint, compress, use_xyz).forward(points, xyz).

    Note (ToMe semantics): r = N - npoint is clamped to N // 2, so when npoint < ceil(N/2)
    the merged token count is N - N // 2, not npoint.
    """
    B, N, C = points.shape
    r = N - int(npoint)
    metric = xyz if use_xyz else points
    pmerger, punmerger = bipartite_soft_matching(metric, r)

    # Fuse the two merges (points: C lanes, xyz: 3 lanes) into one lane-denser slab so the
    # routing matmul / gathers / stores run once instead of twice on a 3-lane tensor.
    # (Intentionally NOT padded to 128 lanes: this kernel is HBM-bound.)
    fused = jnp.concatenate(
        [points.astype(jnp.float32), xyz.astype(jnp.float32)], axis=-1)       # (B, N, C+3)
    merged_fused = pmerger(fused)
    merged_pts = merged_fused[:, :, :C].astype(points.dtype)
    merged_xyz = merged_fused[:, :, C:].astype(xyz.dtype)

    compressed_pts = None
    compressed_xyz = None
    if compress:
        compressed_fused = punmerger(merged_fused)
        compressed_pts = compressed_fused[:, :, :C].astype(points.dtype)
        compressed_xyz = compressed_fused[:, :, C:].astype(xyz.dtype)
    return merged_pts, compressed_pts, merged_xyz, compressed_xyz


# -------------------------------------------------------------------- pure-JAX reference
def _reference_forward(points, xyz, npoint, compress=False, use_xyz=False):
    """Straightforward f32 XLA reference mirroring the PyTorch module (for validation)."""
    B, N, C = points.shape
    r = max(0, min(N - int(npoint), N // 2))
    metric = xyz if use_xyz else points

    if r <= 0:
        merge = lambda x: x
        unmerge = lambda x: x
    else:
        m = metric.astype(jnp.float32)
        m = m * jax.lax.rsqrt(jnp.maximum(jnp.sum(m * m, axis=-1, keepdims=True), 1e-12))
        a, b = m[:, 0::2, :], m[:, 1::2, :]
        Tb = b.shape[1]
        scores = jnp.einsum("btc,bsc->bts", a, b, precision=jax.lax.Precision.HIGHEST)
        node_max = jnp.max(scores, axis=-1)
        node_idx = jnp.argmax(scores, axis=-1)
        edge_idx = jnp.argsort(-node_max, axis=-1)
        unm_idx, src_idx = edge_idx[:, r:], edge_idx[:, :r]
        dst_idx = jnp.take_along_axis(node_idx, src_idx, axis=1)

        def merge(x):
            xf = x.astype(jnp.float32)
            src_h, dst_h = xf[:, 0::2, :], xf[:, 1::2, :]
            unm = jnp.take_along_axis(src_h, unm_idx[..., None], axis=1)
            src = jnp.take_along_axis(src_h, src_idx[..., None], axis=1)
            w = jax.nn.one_hot(dst_idx, Tb, dtype=jnp.float32)
            sums = jnp.einsum("brt,brc->btc", w, src, precision=jax.lax.Precision.HIGHEST)
            cnt = jnp.sum(w, axis=1)
            dst = (dst_h + sums) / (1.0 + cnt)[..., None]
            return jnp.concatenate([unm, dst], axis=1).astype(x.dtype)

        def unmerge(x):
            unm_len = unm_idx.shape[1]
            unm, dst = x[:, :unm_len, :], x[:, unm_len:, :]
            src = jnp.take_along_axis(dst, dst_idx[..., None], axis=1)
            Bx, _, Cx = x.shape
            out = jnp.zeros((Bx, N, Cx), x.dtype)
            out = out.at[:, 1::2, :].set(dst)
            bb = jnp.arange(Bx)[:, None]
            out = out.at[bb, 2 * unm_idx, :].set(unm)
            out = out.at[bb, 2 * src_idx, :].set(src)
            return out

    merged_pts = merge(points)
    merged_xyz = merge(xyz)
    compressed_pts = unmerge(merged_pts) if compress else None
    compressed_xyz = unmerge(merged_xyz) if compress else None
    return merged_pts, compressed_pts, merged_xyz, compressed_xyz


# ------------------------------------------------------------------------------- driver
if __name__ == "__main__":
    B, N, C = 2, 16, 32

    key = jax.random.PRNGKey(0)
    kp, kx = jax.random.split(key)
    points = jax.random.normal(kp, (B, N, C), dtype=jnp.float32)
    xyz = jax.random.normal(kx, (B, N, 3), dtype=jnp.float32)

    configs = [
        dict(npoint=10, compress=True, use_xyz=False),   # r = 6, feature metric
        dict(npoint=12, compress=False, use_xyz=True),   # r = 4, xyz metric (C=3 pad path)
    ]

    for cfg in configs:
        fwd = jax.jit(functools.partial(merge_forward, **cfg))
        outs = fwd(points, xyz)
        jax.block_until_ready(outs)

        r_eff = max(0, min(N - cfg["npoint"], N // 2))
        merged_n = N - r_eff
        assert outs[0].shape == (B, merged_n, C)
        assert outs[2].shape == (B, merged_n, 3)
        if cfg["compress"]:
            assert outs[1].shape == (B, N, C)
            assert outs[3].shape == (B, N, 3)

        ref = _reference_forward(points, xyz, **cfg)
        for got, want in zip(outs, ref):
            if want is None:
                assert got is None
                continue
            assert got.shape == want.shape
            err = float(jnp.max(jnp.abs(got.astype(jnp.float32) - want.astype(jnp.float32))))
            assert err < 1e-3, f"mismatch vs reference (max abs err {err})"

    print("KERNEL_OK")
</pallas_src>

<mosaic_0001>
module attributes {stable_mosaic.version = 11 : i64} {
  func.func @_score_kernel(%arg0: i32, %arg1: i32, %arg2: i32, %arg3: memref<1x8x32xf32, #tpu.memory_space<vmem>>, %arg4: memref<1x8x32xf32, #tpu.memory_space<vmem>>, %arg5: memref<1x8x1xf32, #tpu.memory_space<vmem>>, %arg6: memref<1x8x1xi32, #tpu.memory_space<vmem>>, %arg7: memref<8x1xf32, #tpu.memory_space<vmem>>, %arg8: memref<8x1xi32, #tpu.memory_space<vmem>>) attributes {dimension_semantics = [#tpu.dimension_semantics<parallel>, #tpu.dimension_semantics<parallel>, #tpu.dimension_semantics<arbitrary>], iteration_bounds = array<i64: 2, 1, 1>, scalar_prefetch = 0 : i64, scratch_operands = 2 : i64, tpu.core_type = #tpu.core_type<tc>, window_params = [{transform_indices = @transform_0, window_bounds = array<i64: 1, 8, 32>}, {transform_indices = @transform_1, window_bounds = array<i64: 1, 8, 32>}, {transform_indices = @transform_2, window_bounds = array<i64: 1, 8, 1>}, {transform_indices = @transform_3, window_bounds = array<i64: 1, 8, 1>}]} {
    %c0_i32 = arith.constant 0 : i32
    %0 = arith.cmpi eq, %arg2, %c0_i32 : i32
    %1 = arith.extui %0 : i1 to i32
    %c0_i32_0 = arith.constant 0 : i32
    %2 = arith.cmpi ne, %1, %c0_i32_0 : i32
    scf.if %2 {
      %cst_22 = arith.constant 0xFF800000 : f32
      %35 = vector.broadcast %cst_22 : f32 to vector<8x1xf32>
      %c0_23 = arith.constant 0 : index
      %c0_24 = arith.constant 0 : index
      %36 = vector.load %arg7[%c0_23, %c0_24] : memref<8x1xf32, #tpu.memory_space<vmem>>, vector<8x1xf32>
      tpu.vector_store %arg7[%c0_23, %c0_24], %35 {strides = array<i32>} : memref<8x1xf32, #tpu.memory_space<vmem>>, vector<8x1xf32>,
      %c0_i32_25 = arith.constant 0 : i32
      %37 = vector.broadcast %c0_i32_25 : i32 to vector<8x1xi32>
      %c0_26 = arith.constant 0 : index
      %c0_27 = arith.constant 0 : index
      %38 = vector.load %arg8[%c0_26, %c0_27] : memref<8x1xi32, #tpu.memory_space<vmem>>, vector<8x1xi32>
      tpu.vector_store %arg8[%c0_26, %c0_27], %37 {strides = array<i32>} : memref<8x1xi32, #tpu.memory_space<vmem>>, vector<8x1xi32>,
    } else {
    }
    %c0 = arith.constant 0 : index
    %c0_1 = arith.constant 0 : index
    %c0_2 = arith.constant 0 : index
    %3 = vector.load %arg3[%c0, %c0_1, %c0_2] : memref<1x8x32xf32, #tpu.memory_space<vmem>>, vector<1x8x32xf32>
    %4 = vector.shape_cast %3 : vector<1x8x32xf32> to vector<8x32xf32>
    %c0_i32_3 = arith.constant 0 : i32
    %c8_i32 = arith.constant 8 : i32
    %5 = arith.muli %c0_i32_3, %c8_i32 : i32
    %6 = tpu.assume_multiple %5, 8 : i32
    %c0_4 = arith.constant 0 : index
    %7 = arith.index_cast %6 : i32 to index
    %c0_5 = arith.constant 0 : index
    %8 = vector.load %arg4[%c0_4, %7, %c0_5] : memref<1x8x32xf32, #tpu.memory_space<vmem>>, vector<1x8x32xf32>
    %9 = vector.shape_cast %8 : vector<1x8x32xf32> to vector<8x32xf32>
    %cst = arith.constant dense<0.000000e+00> : vector<8x8xf32>
    %10 = tpu.matmul %4, %9, %cst {dimension_numbers = #tpu.dot_dimension_numbers<[1], [1], [0], [0], [0, 0, 1, 0], [], []>} : vector<8x32xf32>, vector<8x32xf32>, vector<8x8xf32> -> vector<8x8xf32>
    %cst_6 = arith.constant dense<0xFF800000> : vector<8xf32>
    %11 = vector.multi_reduction <maximumf>, %10, %cst_6 [1] : vector<8x8xf32> to vector<8xf32>
    %12 = vector.shape_cast %11 : vector<8xf32> to vector<8x1xf32>
    %13 = tpu.iota {dimensions = array<i32: 1>} : vector<8x8xi32>
    %14 = vector.broadcast %12 : vector<8x1xf32> to vector<8x8xf32>
    %15 = arith.cmpf oeq, %10, %14 : vector<8x8xf32>
    %c8_i32_7 = arith.constant 8 : i32
    %16 = vector.broadcast %c8_i32_7 : i32 to vector<8x8xi32>
    %17 = arith.select %15, %13, %16 : vector<8x8xi1>, vector<8x8xi32>
    %cst_8 = arith.constant dense<2147483647> : vector<8xi32>
    %18 = vector.multi_reduction <minsi>, %17, %cst_8 [1] : vector<8x8xi32> to vector<8xi32>
    %19 = vector.shape_cast %18 : vector<8xi32> to vector<8x1xi32>
    %c8_i32_9 = arith.constant 8 : i32
    %20 = arith.muli %arg2, %c8_i32_9 : i32
    %21 = arith.addi %20, %6 : i32
    %22 = vector.broadcast %21 : i32 to vector<8x1xi32>
    %23 = arith.addi %19, %22 : vector<8x1xi32>
    %c0_10 = arith.constant 0 : index
    %c0_11 = arith.constant 0 : index
    %24 = vector.load %arg7[%c0_10, %c0_11] : memref<8x1xf32, #tpu.memory_space<vmem>>, vector<8x1xf32>
    %25 = arith.cmpf ogt, %12, %24 : vector<8x1xf32>
    %c0_12 = arith.constant 0 : index
    %c0_13 = arith.constant 0 : index
    %26 = vector.load %arg7[%c0_12, %c0_13] : memref<8x1xf32, #tpu.memory_space<vmem>>, vector<8x1xf32>
    %27 = arith.select %25, %12, %26 : vector<8x1xi1>, vector<8x1xf32>
    %c0_14 = arith.constant 0 : index
    %c0_15 = arith.constant 0 : index
    %28 = vector.load %arg7[%c0_14, %c0_15] : memref<8x1xf32, #tpu.memory_space<vmem>>, vector<8x1xf32>
    tpu.vector_store %arg7[%c0_14, %c0_15], %27 {strides = array<i32>} : memref<8x1xf32, #tpu.memory_space<vmem>>, vector<8x1xf32>,
    %c0_16 = arith.constant 0 : index
    %c0_17 = arith.constant 0 : index
    %29 = vector.load %arg8[%c0_16, %c0_17] : memref<8x1xi32, #tpu.memory_space<vmem>>, vector<8x1xi32>
    %30 = arith.select %25, %23, %29 : vector<8x1xi1>, vector<8x1xi32>
    %c0_18 = arith.constant 0 : index
    %c0_19 = arith.constant 0 : index
    %31 = vector.load %arg8[%c0_18, %c0_19] : memref<8x1xi32, #tpu.memory_space<vmem>>, vector<8x1xi32>
    tpu.vector_store %arg8[%c0_18, %c0_19], %30 {strides = array<i32>} : memref<8x1xi32, #tpu.memory_space<vmem>>, vector<8x1xi32>,
    %c1_i32 = arith.constant 1 : i32
    %c0_i32_20 = arith.constant 0 : i32
    %32 = arith.cmpi eq, %arg2, %c0_i32_20 : i32
    %33 = arith.extui %32 : i1 to i32
    %c0_i32_21 = arith.constant 0 : i32
    %34 = arith.cmpi ne, %33, %c0_i32_21 : i32
    scf.if %34 {
      %c0_22 = arith.constant 0 : index
      %c0_23 = arith.constant 0 : index
      %35 = vector.load %arg7[%c0_22, %c0_23] : memref<8x1xf32, #tpu.memory_space<vmem>>, vector<8x1xf32>
      %c0_24 = arith.constant 0 : index
      %c0_25 = arith.constant 0 : index
      %c0_26 = arith.constant 0 : index
      %36 = vector.load %arg5[%c0_24, %c0_25, %c0_26] : memref<1x8x1xf32, #tpu.memory_space<vmem>>, vector<1x8x1xf32>
      %37 = vector.shape_cast %36 : vector<1x8x1xf32> to vector<8x1xf32>
      %38 = vector.shape_cast %35 : vector<8x1xf32> to vector<1x8x1xf32>
      tpu.vector_store %arg5[%c0_24, %c0_25, %c0_26], %38 {strides = array<i32>} : memref<1x8x1xf32, #tpu.memory_space<vmem>>, vector<1x8x1xf32>,
      %c0_27 = arith.constant 0 : index
      %c0_28 = arith.constant 0 : index
      %39 = vector.load %arg8[%c0_27, %c0_28] : memref<8x1xi32, #tpu.memory_space<vmem>>, vector<8x1xi32>
      %c0_29 = arith.constant 0 : index
      %c0_30 = arith.constant 0 : index
      %c0_31 = arith.constant 0 : index
      %40 = vector.load %arg6[%c0_29, %c0_30, %c0_31] : memref<1x8x1xi32, #tpu.memory_space<vmem>>, vector<1x8x1xi32>
      %41 = vector.shape_cast %40 : vector<1x8x1xi32> to vector<8x1xi32>
      %42 = vector.shape_cast %39 : vector<8x1xi32> to vector<1x8x1xi32>
      tpu.vector_store %arg6[%c0_29, %c0_30, %c0_31], %42 {strides = array<i32>} : memref<1x8x1xi32, #tpu.memory_space<vmem>>, vector<1x8x1xi32>,
    } else {
    }
    return
  }
  func.func @transform_0(%arg0: i32, %arg1: i32, %arg2: i32) -> (i32, i32, i32) {
    %c0_i32 = arith.constant 0 : i32
    %c0_i32_0 = arith.constant 0 : i32
    return %arg0, %arg1, %c0_i32 : i32, i32, i32
  }
  func.func @transform_1(%arg0: i32, %arg1: i32, %arg2: i32) -> (i32, i32, i32) {
    %c0_i32 = arith.constant 0 : i32
    %c0_i32_0 = arith.constant 0 : i32
    return %arg0, %arg2, %c0_i32 : i32, i32, i32
  }
  func.func @transform_2(%arg0: i32, %arg1: i32, %arg2: i32) -> (i32, i32, i32) {
    %c0_i32 = arith.constant 0 : i32
    %c0_i32_0 = arith.constant 0 : i32
    return %arg0, %arg1, %c0_i32 : i32, i32, i32
  }
  func.func @transform_3(%arg0: i32, %arg1: i32, %arg2: i32) -> (i32, i32, i32) {
    %c0_i32 = arith.constant 0 : i32
    %c0_i32_0 = arith.constant 0 : i32
    return %arg0, %arg1, %c0_i32 : i32, i32, i32
  }
}

module attributes {stable_mosaic.version = 11 : i64} {
  func.func @_merge_kernel(%arg0: i32, %arg1: i32, %arg2: memref<1x1x8xi32, #tpu.memory_space<vmem>>, %arg3: memref<1x8x35xf32, #tpu.memory_space<vmem>>, %arg4: memref<1x8x35xf32, #tpu.memory_space<vmem>>, %arg5: memref<1x8x35xf32, #tpu.memory_space<vmem>>, %arg6: memref<8x35xf32, #tpu.memory_space<vmem>>, %arg7: memref<8x1xf32, #tpu.memory_space<vmem>>) attributes {dimension_semantics = [#tpu.dimension_semantics<parallel>, #tpu.dimension_semantics<arbitrary>], iteration_bounds = array<i64: 2, 1>, scalar_prefetch = 0 : i64, scratch_operands = 2 : i64, tpu.core_type = #tpu.core_type<tc>, window_params = [{transform_indices = @transform_0, window_bounds = array<i64: 1, 1, 8>}, {transform_indices = @transform_1, window_bounds = array<i64: 1, 8, 35>}, {transform_indices = @transform_2, window_bounds = array<i64: 1, 8, 35>}, {transform_indices = @transform_3, window_bounds = array<i64: 1, 8, 35>}]} {
    %c0_i32 = arith.constant 0 : i32
    %0 = arith.cmpi eq, %arg1, %c0_i32 : i32
    %1 = arith.extui %0 : i1 to i32
    %c0_i32_0 = arith.constant 0 : i32
    %2 = arith.cmpi ne, %1, %c0_i32_0 : i32
    scf.if %2 {
      %cst_14 = arith.constant 0.000000e+00 : f32
      %32 = vector.broadcast %cst_14 : f32 to vector<8x35xf32>
      %c0_15 = arith.constant 0 : index
      %c0_16 = arith.constant 0 : index
      %33 = vector.load %arg6[%c0_15, %c0_16] : memref<8x35xf32, #tpu.memory_space<vmem>>, vector<8x35xf32>
      tpu.vector_store %arg6[%c0_15, %c0_16], %32 {strides = array<i32>} : memref<8x35xf32, #tpu.memory_space<vmem>>, vector<8x35xf32>,
      %cst_17 = arith.constant 0.000000e+00 : f32
      %34 = vector.broadcast %cst_17 : f32 to vector<8x1xf32>
      %c0_18 = arith.constant 0 : index
      %c0_19 = arith.constant 0 : index
      %35 = vector.load %arg7[%c0_18, %c0_19] : memref<8x1xf32, #tpu.memory_space<vmem>>, vector<8x1xf32>
      tpu.vector_store %arg7[%c0_18, %c0_19], %34 {strides = array<i32>} : memref<8x1xf32, #tpu.memory_space<vmem>>, vector<8x1xf32>,
    } else {
    }
    %c0 = arith.constant 0 : index
    %c0_1 = arith.constant 0 : index
    %c0_2 = arith.constant 0 : index
    %3 = vector.load %arg2[%c0, %c0_1, %c0_2] : memref<1x1x8xi32, #tpu.memory_space<vmem>>, vector<1x1x8xi32>
    %4 = vector.shape_cast %3 : vector<1x1x8xi32> to vector<1x8xi32>
    %c0_i32_3 = arith.constant 0 : i32
    %c8_i32 = arith.constant 8 : i32
    %5 = arith.muli %c0_i32_3, %c8_i32 : i32
    %6 = tpu.assume_multiple %5, 8 : i32
    %7 = tpu.iota {dimensions = array<i32: 0>} : vector<8x8xi32>
    %8 = vector.broadcast %6 : i32 to vector<8x8xi32>
    %9 = arith.addi %7, %8 : vector<8x8xi32>
    %10 = vector.broadcast %4 : vector<1x8xi32> to vector<8x8xi32>
    %11 = arith.cmpi eq, %9, %10 : vector<8x8xi32>
    %12 = arith.extui %11 : vector<8x8xi1> to vector<8x8xi32>
    %13 = arith.sitofp %12 : vector<8x8xi32> to vector<8x8xf32>
    %14 = arith.index_cast %6 : i32 to index
    %c0_4 = arith.constant 0 : index
    %15 = vector.load %arg6[%14, %c0_4] : memref<8x35xf32, #tpu.memory_space<vmem>>, vector<8x35xf32>
    %c0_5 = arith.constant 0 : index
    %c0_6 = arith.constant 0 : index
    %c0_7 = arith.constant 0 : index
    %16 = vector.load %arg3[%c0_5, %c0_6, %c0_7] : memref<1x8x35xf32, #tpu.memory_space<vmem>>, vector<1x8x35xf32>
    %17 = vector.shape_cast %16 : vector<1x8x35xf32> to vector<8x35xf32>
    %cst = arith.constant dense<0.000000e+00> : vector<8x35xf32>
    %18 = tpu.matmul %13, %17, %cst {dimension_numbers = #tpu.dot_dimension_numbers<[1], [0], [0], [1], [0, 0, 1, 1], [], []>} : vector<8x8xf32>, vector<8x35xf32>, vector<8x35xf32> -> vector<8x35xf32>
    %19 = arith.addf %15, %18 : vector<8x35xf32>
    %20 = arith.index_cast %6 : i32 to index
    %c0_8 = arith.constant 0 : index
    %21 = vector.load %arg6[%20, %c0_8] : memref<8x35xf32, #tpu.memory_space<vmem>>, vector<8x35xf32>
    tpu.vector_store %arg6[%20, %c0_8], %19 {strides = array<i32>} : memref<8x35xf32, #tpu.memory_space<vmem>>, vector<8x35xf32>,
    %22 = arith.index_cast %6 : i32 to index
    %c0_9 = arith.constant 0 : index
    %23 = vector.load %arg7[%22, %c0_9] : memref<8x1xf32, #tpu.memory_space<vmem>>, vector<8x1xf32>
    %cst_10 = arith.constant dense<0.000000e+00> : vector<8xf32>
    %24 = vector.multi_reduction <add>, %13, %cst_10 [1] : vector<8x8xf32> to vector<8xf32>
    %25 = vector.shape_cast %24 : vector<8xf32> to vector<8x1xf32>
    %26 = arith.addf %23, %25 : vector<8x1xf32>
    %27 = arith.index_cast %6 : i32 to index
    %c0_11 = arith.constant 0 : index
    %28 = vector.load %arg7[%27, %c0_11] : memref<8x1xf32, #tpu.memory_space<vmem>>, vector<8x1xf32>
    tpu.vector_store %arg7[%27, %c0_11], %26 {strides = array<i32>} : memref<8x1xf32, #tpu.memory_space<vmem>>, vector<8x1xf32>,
    %c1_i32 = arith.constant 1 : i32
    %c0_i32_12 = arith.constant 0 : i32
    %29 = arith.cmpi eq, %arg1, %c0_i32_12 : i32
    %30 = arith.extui %29 : i1 to i32
    %c0_i32_13 = arith.constant 0 : i32
    %31 = arith.cmpi ne, %30, %c0_i32_13 : i32
    scf.if %31 {
      %c0_14 = arith.constant 0 : index
      %c0_15 = arith.constant 0 : index
      %c0_16 = arith.constant 0 : index
      %32 = vector.load %arg4[%c0_14, %c0_15, %c0_16] : memref<1x8x35xf32, #tpu.memory_space<vmem>>, vector<1x8x35xf32>
      %33 = vector.shape_cast %32 : vector<1x8x35xf32> to vector<8x35xf32>
      %c0_17 = arith.constant 0 : index
      %c0_18 = arith.constant 0 : index
      %34 = vector.load %arg6[%c0_17, %c0_18] : memref<8x35xf32, #tpu.memory_space<vmem>>, vector<8x35xf32>
      %35 = arith.addf %33, %34 : vector<8x35xf32>
      %c0_19 = arith.constant 0 : index
      %c0_20 = arith.constant 0 : index
      %36 = vector.load %arg7[%c0_19, %c0_20] : memref<8x1xf32, #tpu.memory_space<vmem>>, vector<8x1xf32>
      %cst_21 = arith.constant 1.000000e+00 : f32
      %37 = vector.broadcast %cst_21 : f32 to vector<8x1xf32>
      %38 = arith.addf %37, %36 : vector<8x1xf32>
      %39 = vector.broadcast %38 : vector<8x1xf32> to vector<8x35xf32>
      %40 = arith.divf %35, %39 : vector<8x35xf32>
      %c0_22 = arith.constant 0 : index
      %c0_23 = arith.constant 0 : index
      %c0_24 = arith.constant 0 : index
      %41 = vector.load %arg5[%c0_22, %c0_23, %c0_24] : memref<1x8x35xf32, #tpu.memory_space<vmem>>, vector<1x8x35xf32>
      %42 = vector.shape_cast %41 : vector<1x8x35xf32> to vector<8x35xf32>
      %43 = vector.shape_cast %40 : vector<8x35xf32> to vector<1x8x35xf32>
      tpu.vector_store %arg5[%c0_22, %c0_23, %c0_24], %43 {strides = array<i32>} : memref<1x8x35xf32, #tpu.memory_space<vmem>>, vector<1x8x35xf32>,
    } else {
    }
    return
  }
  func.func @transform_0(%arg0: i32, %arg1: i32) -> (i32, i32, i32) {
    %c0_i32 = arith.constant 0 : i32
    %c0_i32_0 = arith.constant 0 : i32
    return %arg0, %c0_i32, %arg1 : i32, i32, i32
  }
  func.func @transform_1(%arg0: i32, %arg1: i32) -> (i32, i32, i32) {
    %c0_i32 = arith.constant 0 : i32
    %c0_i32_0 = arith.constant 0 : i32
    return %arg0, %arg1, %c0_i32 : i32, i32, i32
  }
  func.func @transform_2(%arg0: i32, %arg1: i32) -> (i32, i32, i32) {
    %c0_i32 = arith.constant 0 : i32
    %c0_i32_0 = arith.constant 0 : i32
    %c0_i32_1 = arith.constant 0 : i32
    return %arg0, %c0_i32, %c0_i32_0 : i32, i32, i32
  }
  func.func @transform_3(%arg0: i32, %arg1: i32) -> (i32, i32, i32) {
    %c0_i32 = arith.constant 0 : i32
    %c0_i32_0 = arith.constant 0 : i32
    %c0_i32_1 = arith.constant 0 : i32
    return %arg0, %c0_i32, %c0_i32_0 : i32, i32, i32
  }
}

</mosaic_0001>

<bundles_post_ra>
// kernel: neg.0
= control target key start
LH: loop header
LB: loop body
LE: loop exit
PB: predicated region body
PF: predicated region fallthrough
CT: control target
= control target key end

     0   :  { %s40_s0 = inlined_call_operand.vmem [shape: f32[2,8,1], index: 0, kind: input, shape index: {}]   ;;  %s41_s1 = inlined_call_operand.vmem [shape: f32[2,8,1], index: 1, kind: output, shape index: {}]  }
   0x1   :  { %v2_v0 = vld [vmem:[%s40_s0] sm:$0xff]  ;;  %v16_v1 = vld [vmem:[%s40_s0 + $0x8] sm:$0xff] }
   0x2   :  { %v5_v2 = vxor.u32 2147483648, %v2_v0  ;;  %v12_v3 = vxor.u32 2147483648, %v16_v1 }
   0x4   :  { %7 = vst [vmem:[%s41_s1] sm:$0xff] %v5_v2 }
   0x5   :  { %17 = vst [vmem:[%s41_s1 + $0x8] sm:$0xff] %v12_v3 }

// kernel: merge_forward.2
= control target key start
LH: loop header
LB: loop body
LE: loop exit
PB: predicated region body
PF: predicated region fallthrough
CT: control target
= control target key end

     0   :  { %s547_s12 = smov 0   ;;  %s549_s13 = smov 0   ;;  %s600_s0 = inlined_call_operand.vmem [shape: f32[2,8,32], index: 0, kind: input, shape index: {}]   ;;  %s601_s1 = inlined_call_operand.vmem [shape: f32[2,8,32], index: 1, kind: input, shape index: {}]   ;;  %s602_s2 = inlined_call_operand.vmem [shape: f32[2,8,1], index: 2, kind: output, shape index: {0}]   ;;  %s603_s3 = inlined_call_operand.vmem [shape: s32[2,8,1], index: 3, kind: output, shape index: {1}]  }
   0x1   :  { %s551_s14 = smov 0  }
   0x2 LB: > { %s33_s15 = sadd.s32 1, %s519_s13  ;;  %p466_p0 = scmp.ge.s32.totalorder %s523_s14, 1  ;;  %s523_s14 = sphi %s551_s14, %s14_s14   ;;  %s519_s13 = sphi %s549_s13, %s605_s13   ;;  %s515_s12 = sphi %s547_s12, %s604_s12  }
   0x3   : > { %p35_p1 = scmp.ge.s32.totalorder %s33_s15, 2  ;;  %p181_p2 = scmp.lt.s32.totalorder %s523_s14, 3 }
   0x5   : > { %s607_s15 = smov (%p35_p1, %s33_s15), 0  ;;  %p182_p3 = pnand %p466_p0, %p181_p2 }
   0x6   : > { %p223_p4 = scmp.lt.s32.totalorder (!%p182_p3), %s515_s12, 1 }
   0x7   : > { %185 = sbr.rel (%p182_p3) target bundleno = 517 (0x205), region = 28 }
   0xc   : > { %s609_s12 = smov (!%p223_p4, %s515_s12), 1  ;;  %vm260_vm0 = vcmask 261120   ;;  %vm255_vm1 = vcmask 7168   ;;  %v525_v2 = vmov -inf   ;;  %vm287_vm2 = vcmask 64512  }
   0xd   : > { %s565_s16 = sshll.u32 %s609_s12, 3  ;;  %256 = vst.msk [vmem:[#allocation2] sm:$0xff] %vm255_vm1, %v525_v2  ;;  %v291_v5 = vlaneseq  ;;  %v526_v15 = vmov 0  }
   0xe   : > { %s236_s19 = scalar_lea.vmem %s601_s1, %s565_s16  ;;  %s229_s22 = scalar_lea.vmem %s600_s0, %s565_s16  ;;  %257 = vst.msk [vmem:[#allocation3] sm:$0xff] %vm255_vm1, %v526_v15 }
   0xf   : > { %v259_v0 = vld [vmem:[%s236_s19] sm:$0xff]  ;;  %v292_v7 = vand.u32 127, %v291_v5  ;;  %s243_s25 = scalar_lea.vmem %s602_s2, %s565_s16  ;;  %s250_s28 = scalar_lea.vmem %s603_s3, %s565_s16 }
  0x10   : > { %471 = vmatpush.xpose.msk.msra.mxu0 %vm260_vm0, %v259_v0  ;;  %v258_v1 = vld [vmem:[%s229_s22] sm:$0xff] }
  0x13   : > { %472 = vmatmul.msk.f32.vlgmr.msra.gmra.mxu0 %vm260_vm0, %v258_v1 }
  0x14   : > { %v314_v6 = vld [vmem:[#allocation2] sm:$0xff] }
  0x15   : > { %v319_v24 = vld [vmem:[#allocation3] sm:$0xff] }
  0x90   : > { %v284_v3 = vpop.f32.mrf.mxu0 }
  0x91   : > { %v288_v4 = vsel %vm287_vm2, %v284_v3, -inf }
  0x92   : > { %289 = vmax.xlane.f32.xlu0 %v288_v4 }
 0x105   : > { %v290_v8 = vpop.xlane.xlu0 %289 }
 0x106   : > { %vm293_vm3 = vcmp.eq.f32.partialorder %v284_v3, %v290_v8  ;;  %vm315_vm4 = vcmp.gt.f32.partialorder %v290_v8, %v314_v6 }
 0x107   : > { %v316_v9 = vsel %vm315_vm4, %v290_v8, %v314_v6  ;;  %v294_v10 = vsel %vm293_vm3, %v292_v7, 8 }
 0x108   : > { %318 = vst.msk [vmem:[#allocation2] sm:$0xff] %vm255_vm1, %v316_v9  ;;  %v295_v11 = vsel %vm287_vm2, %v294_v10, 2147483647 }
 0x109   : > { %v297_v12 = vshra.s32 %v295_v11, 16  ;;  %v296_v16 = vand.u32 65535, %v295_v11 }
 0x10b   : > { %v299_v13 = vcvt.s32.f32 %v297_v12  ;;  %v298_v18 = vcvt.s32.f32 %v296_v16 }
 0x10d   : > { %300 = vmin.xlane.f32.xlu0 %v299_v13 }
 0x10f   : > { %v325_v14 = vld [vmem:[#allocation2] sm:$0xff] }
 0x110   : > { %326 = vst.msk [vmem:[%s243_s25] sm:$0xff] %vm255_vm1, %v325_v14 }
 0x180   : > { %v301_v17 = vpop.xlane.xlu0 %300 }
 0x181   : > { %vm302_vm5 = vcmp.eq.f32.partialorder %v299_v13, %v301_v17  ;;  %v307_v20 = vcvt.f32.s32 %v301_v17 }
 0x182   : > { %v303_v19 = vsel %vm302_vm5, %v298_v18, inf }
 0x183   : > { %304 = vmin.xlane.f32.xlu1 %v303_v19  ;;  %v308_v22 = vshll.u32 %v307_v20, 16 }
 0x1f6   : > { %v305_v21 = vpop.xlane.xlu1 %304 }
 0x1f7   : > { %v306_v23 = vcvt.f32.s32 %v305_v21 }
 0x1f9   : > { %v309_v25 = vadd.s32 %v308_v22, %v306_v23 }
 0x1fb   : > { %v320_v26 = vsel %vm315_vm4, %v309_v25, %v319_v24 }
 0x1fc   : > { %321 = vst.msk [vmem:[#allocation3] sm:$0xff] %vm255_vm1, %v320_v26 }
 0x203   : > { %v327_v27 = vld [vmem:[#allocation3] sm:$0xff] }
 0x204   : > { %328 = vst.msk [vmem:[%s250_s28] sm:$0xff] %vm255_vm1, %v327_v27 }
 0x205 PF: > { %s14_s14 = sadd.s32 1, %s523_s14   ;;  %s604_s12 = smov %s519_s13 }
 0x206   : > { %p11_p5 = scmp.ge.s32.totalorder %s14_s14, 4   ;;  %s605_s13 = smov %s607_s15 }
 0x208   :  { %13 = sbr.rel (!%p11_p5) target bundleno = 2 (0x2), region = 81 }

// kernel: merge_forward.3
= control target key start
LH: loop header
LB: loop body
LE: loop exit
PB: predicated region body
PF: predicated region fallthrough
CT: control target
= control target key end

     0   :  { %s489_s12 = smov 0   ;;  %s491_s13 = smov 0   ;;  %s538_s0 = inlined_call_operand.vmem [shape: s32[2,1,8], index: 0, kind: input, shape index: {}]   ;;  %s539_s1 = inlined_call_operand.vmem [shape: f32[2,8,35], index: 1, kind: input, shape index: {}]   ;;  %s540_s2 = inlined_call_operand.vmem [shape: f32[2,8,35], index: 2, kind: input, shape index: {}]   ;;  %s541_s3 = inlined_call_operand.vmem [shape: f32[2,8,35], index: 3, kind: output, shape index: {}]  }
   0x1   :  { %s493_s14 = smov 0  }
   0x2 LB: > { %s25_s15 = sadd.s32 1, %s461_s13  ;;  %p405_p0 = scmp.ge.s32.totalorder %s465_s14, 1  ;;  %s465_s14 = sphi %s493_s14, %s13_s14   ;;  %s461_s13 = sphi %s491_s13, %s543_s13   ;;  %s457_s12 = sphi %s489_s12, %s542_s12  }
   0x3   : > { %p27_p1 = scmp.ge.s32.totalorder %s25_s15, 2  ;;  %p175_p2 = scmp.lt.s32.totalorder %s465_s14, 3 }
   0x5   : > { %s545_s15 = smov (%p27_p1, %s25_s15), 0  ;;  %p176_p3 = pnand %p405_p0, %p175_p2 }
   0x6   : > { %p210_p4 = scmp.lt.s32.totalorder (!%p176_p3), %s457_s12, 1 }
   0x7   : > { %179 = sbr.rel (%p176_p3) target bundleno = 282 (0x11a), region = 32 }
   0xc   : > { %vm235_vm0 = vcmask 285696   ;;  %vm237_vm1 = vcmask 7168   ;;  %v240_v0 = vlaneseq  ;;  %v467_v1 = vmov 0.0   ;;  %s547_s12 = smov (!%p210_p4, %s457_s12), 1 }
   0xd   : > { %236 = vst.msk [vmem:[#allocation2] sm:$0xff] %vm235_vm0, %v467_v1  ;;  %s215_s18 = scalar_lea.vmem %s538_s0, %s547_s12  ;;  %vm250_vm2 = vcmask 64512   ;;  %s512_s19 = sshll.u32 %s547_s12, 3  ;;  %v468_v7 = vmov 0  }
   0xe   : > { %238 = vst.msk [vmem:[#allocation3] sm:$0xff] %vm237_vm1, %v467_v1  ;;  %v241_v2 = vshrl.u32 %v240_v0, 7  ;;  %v440_v3 = vld [vmem:[%s215_s18] ss:$0 sm:$0xff]  ;;  %s222_s22 = scalar_lea.vmem %s539_s1, %s512_s19  ;;  %439 = vset.pattern.permute.xlu0 %v468_v7  ;;  %s226_s25 = scalar_lea.vmem %s540_s2, %s512_s19 }
   0xf   : > { %v249_v6 = vld [vmem:[%s222_s22] sm:$0xff]  ;;  %s230_s28 = scalar_lea.vmem %s541_s3, %s512_s19 }
  0x10   : > { %vm245_vm3 = vcmp.eq.s32.totalorder %v241_v2, %v440_v3  ;;  %269 = vmatpush.msra.mxu0 %v249_v6  ;;  %v287_v20 = vld [vmem:[%s226_s25] sm:$0xff] }
  0x11   : > { %v409_v4 = vsel %vm245_vm3, 1.0, %v467_v1 }
  0x12   : > { %v278_v5 = vsel %vm250_vm2, %v409_v4, 0.0  ;;  %410 = vmatmul.msk.f32.vlgmr.msra.gmra.mxu0 %vm250_vm2, %v409_v4 }
  0x13   : > { %279 = vadd.xlane.f32.xlu0 %v278_v5 }
  0x14   : > { %v248_v13 = vld [vmem:[#allocation2] sm:$0xff] }
  0x15   : > { %v277_v8 = vld [vmem:[#allocation3] sm:$0xff] }
  0x86   : > { %v280_v9 = vpop.xlane.xlu0 %279 }
  0x87   : > { %v281_v10 = vadd.f32 %v280_v9, %v277_v8 }
  0x89   : > { %283 = vst.msk [vmem:[#allocation3] sm:$0xff] %vm237_vm1, %v281_v10 }
  0x8f   : > { %v271_v14 = vpop.f32.mrf.mxu0 }
  0x90   : > { %v290_v11 = vld [vmem:[#allocation3] sm:$0xff]  ;;  %v274_v15 = vadd.f32 %v271_v14, %v248_v13 }
  0x91   : > { %v291_v12 = vadd.f32 1.0, %v290_v11 }
  0x92   : > { %276 = vst.msk [vmem:[#allocation2] sm:$0xff] %vm235_vm0, %v274_v15 }
  0x93   : > { %294 = vperm.xlu0 %439, %v291_v12  }
  0x99   : > { %v288_v22 = vld [vmem:[#allocation2] sm:$0xff] }
  0x9a   : > { %v289_v26 = vadd.f32 %v288_v22, %v287_v20 }
 0x105   : > { %v295_v16 = vpop.permute.xlu0 %294 }
 0x106   : > { %441 = vrcp.f32 %v295_v16  ;;  %v308_v21 = vand.u32 2147483648, %v295_v16  ;;  %v306_v24 = vand.u32 2147483647, %v295_v16  ;;  %vm302_vm5 = vweird.f32 %v295_v16 }
 0x108   : > { %v309_v27 = vor.u32 1.1754944e-38, %v308_v21  ;;  %vm307_vm7 = vcmp.eq.f32.partialorder %v306_v24, 8.507059e+37 }
 0x10c   : > { %v442_v17 = vpop.eup %441 }
 0x10d   : > { %v298_v18 = vmul.f32 %v442_v17, %v295_v16  ;;  %vm303_vm4 = vweird.f32 %v442_v17 }
 0x10e   : > { %vm304_vm6 = vmor %vm302_vm5, %vm303_vm4 }
 0x10f   : > { %v299_v19 = vsub.f32 1.0, %v298_v18 }
 0x111   : > { %v300_v23 = vmul.f32 %v442_v17, %v299_v19 }
 0x113   : > { %v301_v25 = vadd.f32 %v442_v17, %v300_v23 }
 0x115   : > { %v305_v28 = vsel %vm304_vm6, %v442_v17, %v301_v25 }
 0x116   : > { %v310_v29 = vsel %vm307_vm7, %v309_v27, %v305_v28 }
 0x117   : > { %v311_v30 = vmul.f32 %v310_v29, %v289_v26 }
 0x119   : > { %312 = vst.msk [vmem:[%s230_s28] sm:$0xff] %vm235_vm0, %v311_v30 }
 0x11a PF: > { %s13_s14 = sadd.s32 1, %s465_s14   ;;  %s542_s12 = smov %s461_s13 }
 0x11b   : > { %p10_p5 = scmp.ge.s32.totalorder %s13_s14, 4   ;;  %s543_s13 = smov %s545_s15 }
 0x11d   :  { %12 = sbr.rel (!%p10_p5) target bundleno = 2 (0x2), region = 76 }

</bundles_post_ra>
